<compile_context>
chip_gen: v5e
topology: v5e:2x2
jax: 0.10.0
libtpu: 0.0.40
codegen_flags: <defaults>
</compile_context>

<pallas_src>
import functools

import jax
import jax.numpy as jnp
from jax.experimental import pallas as pl
from jax.experimental.pallas import tpu as pltpu


def _round_up(x, m):
    return (x + m - 1) // m * m


# ----------------------------------------------------------------------------
# Pallas kernel: fused (patches @ weight) + bias (+ ReLU) (+ round), M-tiled.
# ----------------------------------------------------------------------------
def _matmul_bias_kernel(x_ref, w_ref, b_ref, o_ref, *, relu, round_out):
    acc = jnp.dot(x_ref[...], w_ref[...], preferred_element_type=jnp.float32)
    acc = acc + b_ref[...]                      # (TM, Cp) + (1, Cp), f32 epilogue
    if relu:
        acc = jnp.maximum(acc, 0.0)
    if round_out:
        acc = jnp.round(acc)                    # matches torch.round (half-to-even)
    o_ref[...] = acc.astype(o_ref.dtype)


def _pallas_matmul_bias(x2d, w2d, b2d, *, relu=False, round_out=False, tile_m=512):
    """y = act(x2d @ w2d + b2d).

    w2d: (K, Cp) and b2d: (1, Cp) must already be column-padded so Cp % 128 == 0
    (lane-dense stores).  Rows (M) are tiled over the grid and padded to the tile.
    """
    M, K = x2d.shape
    Kw, Cp = w2d.shape
    assert Kw == K and Cp % 128 == 0, (Kw, K, Cp)

    tm = min(tile_m, _round_up(M, 8))           # block sublane dim must be 8-aligned
    Mp = _round_up(M, tm)
    if Mp != M:
        x2d = jnp.pad(x2d, ((0, Mp - M), (0, 0)))

    kernel = functools.partial(_matmul_bias_kernel, relu=relu, round_out=round_out)
    out = pl.pallas_call(
        kernel,
        out_shape=jax.ShapeDtypeStruct((Mp, Cp), jnp.float32),
        grid=(Mp // tm,),
        in_specs=[
            pl.BlockSpec((tm, K), lambda i: (i, 0)),      # streamed row tiles
            pl.BlockSpec((K, Cp), lambda i: (0, 0)),      # resident weight
            pl.BlockSpec((1, Cp), lambda i: (0, 0)),      # resident bias
        ],
        out_specs=pl.BlockSpec((tm, Cp), lambda i: (i, 0)),
        compiler_params=pltpu.CompilerParams(
            dimension_semantics=("parallel",),            # megacore-shard the M tiles
            vmem_limit_bytes=48 * 1024 * 1024,            # headroom for v7x's 64 MiB VMEM
        ),
    )(x2d, w2d, b2d)
    return out if Mp == M else out[:M]


# ----------------------------------------------------------------------------
# Weight preparation (done once, in __init__)
# ----------------------------------------------------------------------------
def _pad_cols(w2d, b1d):
    """Zero-pad output channels to a multiple of 128 (lane-dense stores)."""
    cout = w2d.shape[1]
    cp = _round_up(cout, 128)
    if cp != cout:
        w2d = jnp.pad(w2d, ((0, 0), (0, cp - cout)))
        b1d = jnp.pad(b1d, (0, cp - cout))
    return w2d, b1d.reshape(1, cp).astype(jnp.float32)


def _prep_conv(w_hwio, b, dtype):
    """Conv2d(k=3,s=2,p=1): (3,3,Cin,Cout) -> (9*Cin, Cp) matching kh,kw,cin im2col order."""
    cin, cout = w_hwio.shape[2], w_hwio.shape[3]
    w2d, b2d = _pad_cols(w_hwio.reshape(9 * cin, cout), b)
    return w2d.astype(dtype), b2d, cout


def _prep_tconv(w_pt, b, dtype):
    """ConvTranspose2d(k=3,s=2,p=1,op=1) as 4 packed sub-pixel phases.

    w_pt: (Cin, Cout, 3, 3) (nn.ConvTranspose2d layout).
    Returns a (4*Cin, Cp) matrix: row groups = taps [x(i,j), x(i,j+1), x(i+1,j), x(i+1,j+1)],
    column groups = output phases [ee, eo, oe, oo] (even/odd output row, even/odd output col).
    """
    cin, cout = w_pt.shape[0], w_pt.shape[1]
    # equivalent stride-1 conv kernel: flip spatially, swap in/out channels -> (3,3,Cin,Cout)
    w_eq = jnp.transpose(w_pt[:, :, ::-1, ::-1], (2, 3, 0, 1))
    z = jnp.zeros((cin, cout), w_pt.dtype)
    rows = [
        # phase:        ee           eo           oe           oo
        jnp.concatenate([w_eq[1, 1], w_eq[1, 0], w_eq[0, 1], w_eq[0, 0]], axis=1),  # x(i,   j)
        jnp.concatenate([z,          w_eq[1, 2], z,          w_eq[0, 2]], axis=1),  # x(i,   j+1)
        jnp.concatenate([z,          z,          w_eq[2, 1], w_eq[2, 0]], axis=1),  # x(i+1, j)
        jnp.concatenate([z,          z,          z,          w_eq[2, 2]], axis=1),  # x(i+1, j+1)
    ]
    w_comb = jnp.concatenate(rows, axis=0)        # (4*Cin, 4*Cout)
    b_comb = jnp.tile(b, 4)                       # every phase gets the bias
    w_comb, b2d = _pad_cols(w_comb, b_comb)
    return w_comb.astype(dtype), b2d, cout


# ----------------------------------------------------------------------------
# Conv2d(k=3, stride=2, padding=1)  -- NHWC, im2col + Pallas matmul
# ----------------------------------------------------------------------------
def conv2d_s2_k3_p1(x_nhwc, w2d, b2d, cout, *, relu=False, round_out=False, tile_m=512):
    N, H, W, C = x_nhwc.shape
    Ho, Wo = H // 2, W // 2
    xp = jnp.pad(x_nhwc, ((0, 0), (1, 1), (1, 1), (0, 0)))
    # TODO(synk): fold this im2col (2.25x HBM amplification) into the kernel by streaming
    # halo'd NHWC row-bands and accumulating the 9 taps in VMEM.
    cols = [xp[:, kh:kh + 2 * Ho:2, kw:kw + 2 * Wo:2, :]
            for kh in range(3) for kw in range(3)]
    x2d = jnp.concatenate(cols, axis=-1).reshape(N * Ho * Wo, 9 * C).astype(w2d.dtype)
    y2d = _pallas_matmul_bias(x2d, w2d, b2d, relu=relu, round_out=round_out, tile_m=tile_m)
    return y2d[:, :cout].reshape(N, Ho, Wo, cout)


# ----------------------------------------------------------------------------
# ConvTranspose2d(k=3, stride=2, padding=1, output_padding=1) -- NHWC
# Sub-pixel decomposition (no zero-dilation): one matmul over the 2x2 forward
# neighbourhood produces all 4 output phases, which are then interleaved.
# ----------------------------------------------------------------------------
def conv_transpose_s2_k3_p1_op1(x_nhwc, w2d, b2d, cout, *, relu=False, tile_m=512):
    N, H, W, C = x_nhwc.shape
    xp = jnp.pad(x_nhwc, ((0, 0), (0, 1), (0, 1), (0, 0)))   # right/bottom zero halo
    taps = [xp[:, 0:H,     0:W,     :],   # x(i,   j)
            xp[:, 0:H,     1:W + 1, :],   # x(i,   j+1)
            xp[:, 1:H + 1, 0:W,     :],   # x(i+1, j)
            xp[:, 1:H + 1, 1:W + 1, :]]   # x(i+1, j+1)
    x2d = jnp.concatenate(taps, axis=-1).reshape(N * H * W, 4 * C).astype(w2d.dtype)
    y2d = _pallas_matmul_bias(x2d, w2d, b2d, relu=relu, tile_m=tile_m)
    # columns: [ee | eo | oe | oo] (cout each) -> interleave into (N, 2H, 2W, cout)
    y = y2d[:, :4 * cout].reshape(N, H, W, 2, 2, cout)
    y = jnp.transpose(y, (0, 1, 3, 2, 4, 5)).reshape(N, 2 * H, 2 * W, cout)
    return y


# ----------------------------------------------------------------------------
# Full module
# ----------------------------------------------------------------------------
class MotionEncoderDecoderPallas:
    def __init__(self, in_channels=4, latent_channels=256, key=None,
                 compute_dtype=jnp.bfloat16):
        if key is None:
            key = jax.random.PRNGKey(42)

        def conv_params(k, cin, cout):
            k1, k2 = jax.random.split(k)
            bound = 1.0 / float(jnp.sqrt(cin * 9.0))          # Conv2d fan_in = cin*9
            w = jax.random.uniform(k1, (3, 3, cin, cout), jnp.float32, -bound, bound)
            b = jax.random.uniform(k2, (cout,), jnp.float32, -bound, bound)
            return w, b

        def tconv_params(k, cin, cout):
            k1, k2 = jax.random.split(k)
            bound = 1.0 / float(jnp.sqrt(cout * 9.0))         # ConvTranspose2d fan_in = cout*9
            w = jax.random.uniform(k1, (cin, cout, 3, 3), jnp.float32, -bound, bound)
            b = jax.random.uniform(k2, (cout,), jnp.float32, -bound, bound)
            return w, b

        keys = jax.random.split(key, 6)
        # bf16 matmul inputs for the ReLU layers; latent (rounded) layer kept f32
        # for bit-exact torch.round parity.
        self.enc = [
            _prep_conv(*conv_params(keys[0], in_channels, 64), compute_dtype),
            _prep_conv(*conv_params(keys[1], 64, 128), compute_dtype),
            _prep_conv(*conv_params(keys[2], 128, latent_channels), jnp.float32),
        ]
        self.dec = [
            _prep_tconv(*tconv_params(keys[3], latent_channels, 128), compute_dtype),
            _prep_tconv(*tconv_params(keys[4], 128, 64), compute_dtype),
            _prep_tconv(*tconv_params(keys[5], 64, in_channels), compute_dtype),
        ]

    def __call__(self, vs_t, vd_t):
        # vs_t, vd_t: NCHW (PyTorch convention), 2 channels each
        v_t = jnp.concatenate([vs_t, vd_t], axis=1)           # (N, 4, H, W)
        x = jnp.transpose(v_t, (0, 2, 3, 1))                  # NCHW -> NHWC

        # encoder
        x = conv2d_s2_k3_p1(x, *self.enc[0], relu=True)       # H/2
        x = conv2d_s2_k3_p1(x, *self.enc[1], relu=True)       # H/4
        m_hat_nhwc = conv2d_s2_k3_p1(x, *self.enc[2],
                                     relu=False, round_out=True)   # H/8, rounded latent

        # decoder
        y = conv_transpose_s2_k3_p1_op1(m_hat_nhwc, *self.dec[0], relu=True)  # H/4
        y = conv_transpose_s2_k3_p1_op1(y, *self.dec[1], relu=True)           # H/2
        y = conv_transpose_s2_k3_p1_op1(y, *self.dec[2], relu=False)          # H

        v_t_hat = jnp.transpose(y, (0, 3, 1, 2))              # NHWC -> NCHW
        m_t_hat = jnp.transpose(m_hat_nhwc, (0, 3, 1, 2))     # NHWC -> NCHW

        vs_t_hat = v_t_hat[:, :2]                             # torch.split(., 2, dim=1)
        vd_t_hat = v_t_hat[:, 2:4]
        return vs_t_hat, vd_t_hat, m_t_hat


if __name__ == "__main__":
    # --- self-check 1: Pallas fused matmul vs plain-JAX (f32, incl. row/col padding path) ---
    kx, kw, kb = jax.random.split(jax.random.PRNGKey(1), 3)
    xc = jax.random.normal(kx, (137, 100), jnp.float32)
    wc = jax.random.normal(kw, (100, 128), jnp.float32) * 0.1
    bc = jax.random.normal(kb, (128,), jnp.float32)
    got = _pallas_matmul_bias(xc, wc, bc.reshape(1, 128), relu=True)
    want = jnp.maximum(
        jnp.dot(xc, wc, precision=jax.lax.Precision.HIGHEST) + bc, 0.0)
    assert jnp.allclose(got, want, atol=2e-2, rtol=2e-2), \
        float(jnp.max(jnp.abs(got - want)))

    # --- self-check 2: sub-pixel ConvTranspose decomposition vs dilate-and-conv reference ---
    def tconv_ref(x_nhwc, w_pt, b):
        N, H, W, Cin = x_nhwc.shape
        Cout = w_pt.shape[1]
        xd = jnp.zeros((N, 2 * H - 1, 2 * W - 1, Cin), x_nhwc.dtype)
        xd = xd.at[:, ::2, ::2, :].set(x_nhwc)
        xp = jnp.pad(xd, ((0, 0), (1, 2), (1, 2), (0, 0)))
        w_eq = jnp.transpose(w_pt[:, :, ::-1, ::-1], (2, 3, 0, 1)).reshape(9 * Cin, Cout)
        cols = [xp[:, kh:kh + 2 * H, kw:kw + 2 * W, :]
                for kh in range(3) for kw in range(3)]
        x2 = jnp.concatenate(cols, -1).reshape(N * 2 * H * 2 * W, 9 * Cin)
        y = jnp.dot(x2, w_eq, precision=jax.lax.Precision.HIGHEST) + b
        return y.reshape(N, 2 * H, 2 * W, Cout)

    kxt, kwt, kbt = jax.random.split(jax.random.PRNGKey(2), 3)
    xt = jax.random.normal(kxt, (2, 5, 6, 8), jnp.float32)
    wt = jax.random.normal(kwt, (8, 16, 3, 3), jnp.float32) * 0.1
    bt = jax.random.normal(kbt, (16,), jnp.float32) * 0.1
    w_comb, b_comb, cout_t = _prep_tconv(wt, bt, jnp.float32)
    got_t = conv_transpose_s2_k3_p1_op1(xt, w_comb, b_comb, cout_t)
    want_t = tconv_ref(xt, wt, bt)
    assert got_t.shape == want_t.shape, (got_t.shape, want_t.shape)
    assert jnp.allclose(got_t, want_t, atol=2e-2, rtol=2e-2), \
        float(jnp.max(jnp.abs(got_t - want_t)))

    # --- full module at small shapes: batch=2, 2+2 channels, 16x16 spatial ---
    key = jax.random.PRNGKey(0)
    k1, k2 = jax.random.split(key)
    vs_t = jax.random.normal(k1, (2, 2, 16, 16), jnp.float32)
    vd_t = jax.random.normal(k2, (2, 2, 16, 16), jnp.float32)

    model = MotionEncoderDecoderPallas(in_channels=4, latent_channels=256)
    fwd = jax.jit(model.__call__)
    vs_hat, vd_hat, m_hat = fwd(vs_t, vd_t)
    jax.block_until_ready((vs_hat, vd_hat, m_hat))

    assert vs_hat.shape == (2, 2, 16, 16), vs_hat.shape
    assert vd_hat.shape == (2, 2, 16, 16), vd_hat.shape
    assert m_hat.shape == (2, 256, 2, 2), m_hat.shape
    assert bool(jnp.all(m_hat == jnp.round(m_hat)))   # latent is rounded
    print("KERNEL_OK")
</pallas_src>

<mosaic_0001>
module attributes {stable_mosaic.version = 11 : i64} {
  func.func @_matmul_bias_kernel(%arg0: i32, %arg1: memref<144x100xf32, #tpu.memory_space<vmem>>, %arg2: memref<100x128xf32, #tpu.memory_space<vmem>>, %arg3: memref<1x128xf32, #tpu.memory_space<vmem>>, %arg4: memref<144x128xf32, #tpu.memory_space<vmem>>) attributes {dimension_semantics = [#tpu.dimension_semantics<parallel>], iteration_bounds = array<i64: 1>, scalar_prefetch = 0 : i64, scratch_operands = 0 : i64, tpu.core_type = #tpu.core_type<tc>, window_params = [{transform_indices = @transform_0, window_bounds = array<i64: 144, 100>}, {pipeline_mode = #tpu.pipeline_mode<synchronous>, transform_indices = @transform_1, window_bounds = array<i64: 100, 128>}, {pipeline_mode = #tpu.pipeline_mode<synchronous>, transform_indices = @transform_2, window_bounds = array<i64: 1, 128>}, {transform_indices = @transform_3, window_bounds = array<i64: 144, 128>}]} {
    %c0 = arith.constant 0 : index
    %c0_0 = arith.constant 0 : index
    %0 = vector.load %arg1[%c0, %c0_0] : memref<144x100xf32, #tpu.memory_space<vmem>>, vector<144x100xf32>
    %c0_1 = arith.constant 0 : index
    %c0_2 = arith.constant 0 : index
    %1 = vector.load %arg2[%c0_1, %c0_2] : memref<100x128xf32, #tpu.memory_space<vmem>>, vector<100x128xf32>
    %cst = arith.constant dense<0.000000e+00> : vector<144x128xf32>
    %2 = tpu.matmul %0, %1, %cst {dimension_numbers = #tpu.dot_dimension_numbers<[1], [0], [0], [1], [0, 0, 1, 1], [], []>} : vector<144x100xf32>, vector<100x128xf32>, vector<144x128xf32> -> vector<144x128xf32>
    %c0_3 = arith.constant 0 : index
    %c0_4 = arith.constant 0 : index
    %3 = vector.load %arg3[%c0_3, %c0_4] : memref<1x128xf32, #tpu.memory_space<vmem>>, vector<1x128xf32>
    %4 = vector.broadcast %3 : vector<1x128xf32> to vector<144x128xf32>
    %5 = arith.addf %2, %4 : vector<144x128xf32>
    %cst_5 = arith.constant 0.000000e+00 : f32
    %6 = vector.broadcast %cst_5 : f32 to vector<144x128xf32>
    %7 = arith.maximumf %5, %6 : vector<144x128xf32>
    %c0_6 = arith.constant 0 : index
    %c0_7 = arith.constant 0 : index
    %8 = vector.load %arg4[%c0_6, %c0_7] : memref<144x128xf32, #tpu.memory_space<vmem>>, vector<144x128xf32>
    tpu.vector_store %arg4[%c0_6, %c0_7], %7 {strides = array<i32>} : memref<144x128xf32, #tpu.memory_space<vmem>>, vector<144x128xf32>,
    return
  }
  func.func @transform_0(%arg0: i32) -> (i32, i32) {
    %c0_i32 = arith.constant 0 : i32
    %c0_i32_0 = arith.constant 0 : i32
    return %arg0, %c0_i32 : i32, i32
  }
  func.func @transform_1(%arg0: i32) -> (i32, i32) {
    %c0_i32 = arith.constant 0 : i32
    %c0_i32_0 = arith.constant 0 : i32
    %c0_i32_1 = arith.constant 0 : i32
    return %c0_i32, %c0_i32_0 : i32, i32
  }
  func.func @transform_2(%arg0: i32) -> (i32, i32) {
    %c0_i32 = arith.constant 0 : i32
    %c0_i32_0 = arith.constant 0 : i32
    %c0_i32_1 = arith.constant 0 : i32
    return %c0_i32, %c0_i32_0 : i32, i32
  }
  func.func @transform_3(%arg0: i32) -> (i32, i32) {
    %c0_i32 = arith.constant 0 : i32
    %c0_i32_0 = arith.constant 0 : i32
    return %arg0, %c0_i32 : i32, i32
  }
}

</mosaic_0001>

<bundles_post_ra>
// kernel: tpu_custom_call.1
= control target key start
LH: loop header
LB: loop body
LE: loop exit
PB: predicated region body
PF: predicated region fallthrough
CT: control target
= control target key end

     0   :  { %8 = vsyncpa [#allocation3], 0  ;;  %s494_s0 = inlined_call_operand.hbm [shape: f32[144,100], index: 0, kind: input, shape index: {}]   ;;  %s495_s1 = inlined_call_operand.hbm [shape: f32[100,128], index: 1, kind: input, shape index: {}]   ;;  %s496_s2 = inlined_call_operand.vmem [shape: f32[1,128], index: 2, kind: input, shape index: {}]   ;;  %s497_s3 = inlined_call_operand.hbm [shape: f32[144,128], index: 3, kind: output, shape index: {}]  }
   0x1   :  { %9 = vsyncpa [#allocation6], 0 }
   0x2   :  { %10 = vsyncpa [#allocation4], 0  ;;  %s15_s14 = sshll.u32 %s494_s0, 4  ;;  %s410_s15 = smov [#allocation2]   ;;  %s16_s14 = int_to_ptr.hbm [resolvable:$true] %s15_s14 }
   0x3   :  { %s17_s16 = sshll.u32 %s410_s15, 4  ;;  %s28_s19 = sshll.u32 %s495_s1, 4  ;;  %s18_s16 = int_to_ptr.vmem [resolvable:$true] %s17_s16  ;;  %s29_s19 = int_to_ptr.hbm [resolvable:$true] %s28_s19 }
   0x4   :  { %s411_s20 = smov 128   ;;  %s412_s21 = smov 8  }
   0x5   :  { %23 = dma.hbm_to_vmem [thread:$0]  %s16_s14, 2304, %s18_s16, [#allocation3], %s411_s20, %s411_s20, %s412_s21  }
   0x6   :  { %s413_s22 = smov [#allocation5]  }
   0x7   :  { %s30_s23 = sshll.u32 %s413_s22, 4  ;;  %s31_s23 = int_to_ptr.vmem [resolvable:$true] %s30_s23 }
   0x8   :  { %36 = dma.hbm_to_vmem [thread:$0]  %s29_s19, 1664, %s31_s23, [#allocation6], %s411_s20, %s411_s20, %s412_s21  }
   0x9   :  { %404 = dma.done.wait [#allocation3], 2304  }
   0xa   :  { %405 = vsyncadd [#allocation3], 4294964992 }
   0xb   :  { %406 = dma.done.wait [#allocation6], 1664  }
   0xc   :  { %407 = vsyncadd [#allocation6], 4294965632  ;;  %vm137_vm0 = vcmask 1043456   ;;  %v77_v0 = vld [vmem:[#allocation5 + $0x60] sm:$0xf]  ;;  %v76_v1 = vld [vmem:[#allocation5 + $0x58] sm:$0xff] }
   0xd   :  { %288 = vmatpush.msk.msra.mxu2 %vm137_vm0, %v77_v0  ;;  %289 = vmatpush.msk.msra.mxu3 %vm137_vm0, %v77_v0  ;;  %v75_v2 = vld [vmem:[#allocation5 + $0x50] sm:$0xff]  ;;  %v74_v3 = vld [vmem:[#allocation5 + $0x48] sm:$0xff]  ;;  %v73_v4 = vld [vmem:[#allocation5 + $0x40] sm:$0xff]  ;;  %vm82_vm1 = vcmask 818176   ;;  %s254_s27 = sshll.u32 %s497_s3, 4  ;;  %s255_s27 = int_to_ptr.hbm [resolvable:$true] %s254_s27 }
   0xe   :  { %268 = vmatpush.msk.msra.mxu0 %vm137_vm0, %v77_v0  ;;  %287 = vmatpush.msk.msra.mxu1 %vm137_vm0, %v77_v0  ;;  %v72_v5 = vld [vmem:[#allocation5 + $0x38] sm:$0xff]  ;;  %v71_v6 = vld [vmem:[#allocation5 + $0x30] sm:$0xff]  ;;  %v70_v7 = vld [vmem:[#allocation5 + $0x28] sm:$0xff] }
   0xf   :  { %291 = vmatpush.msra.mxu2 %v76_v1  ;;  %292 = vmatpush.msra.mxu3 %v76_v1  ;;  %v69_v8 = vld [vmem:[#allocation5 + $0x20] sm:$0xff]  ;;  %v68_v9 = vld [vmem:[#allocation5 + $0x18] sm:$0xff]  ;;  %v67_v10 = vld [vmem:[#allocation5 + $0x10] sm:$0xff] }
  0x10   :  { %145 = vmatpush.msra.mxu0 %v76_v1  ;;  %290 = vmatpush.msra.mxu1 %v76_v1  ;;  %v66_v11 = vld [vmem:[#allocation5 + $0x8] sm:$0xff]  ;;  %v65_v12 = vld [vmem:[#allocation5] sm:$0xff]  ;;  %v55_v13 = vld [vmem:[#allocation2 + $0x40] sm:$0xff] }
  0x11   :  { %294 = vmatpush.msra.mxu2 %v75_v2  ;;  %295 = vmatpush.msra.mxu3 %v75_v2  ;;  %v60_v14 = vld [vmem:[#allocation2 + $0x68] sm:$0xff]  ;;  %v47_v15 = vld [vmem:[#allocation2] sm:$0xff]  ;;  %v61_v18 = vld [vmem:[#allocation2 + $0x70] sm:$0xff] }
  0x12   :  { %146 = vmatpush.msra.mxu0 %v75_v2  ;;  %293 = vmatpush.msra.mxu1 %v75_v2  ;;  %v51_v16 = vld [vmem:[#allocation2 + $0x20] sm:$0xff]  ;;  %v56_v17 = vld [vmem:[#allocation2 + $0x48] sm:$0xff]  ;;  %v57_v21 = vld [vmem:[#allocation2 + $0x50] sm:$0xff] }
  0x13   :  { %297 = vmatpush.msra.mxu2 %v74_v3  ;;  %298 = vmatpush.msra.mxu3 %v74_v3  ;;  %v48_v19 = vld [vmem:[#allocation2 + $0x8] sm:$0xff]  ;;  %v62_v22 = vld [vmem:[#allocation2 + $0x78] sm:$0xff]  ;;  %v49_v23 = vld [vmem:[#allocation2 + $0x10] sm:$0xff] }
  0x14   :  { %147 = vmatpush.msra.mxu0 %v74_v3  ;;  %296 = vmatpush.msra.mxu1 %v74_v3  ;;  %v52_v20 = vld [vmem:[#allocation2 + $0x28] sm:$0xff]  ;;  %v53_v24 = vld [vmem:[#allocation2 + $0x30] sm:$0xff]  ;;  %v58_v25 = vld [vmem:[#allocation2 + $0x58] sm:$0xff] }
  0x15   :  { %300 = vmatpush.msra.mxu2 %v73_v4  ;;  %301 = vmatpush.msra.mxu3 %v73_v4  ;;  %v63_v26 = vld [vmem:[#allocation2 + $0x80] sm:$0xff]  ;;  %v50_v27 = vld [vmem:[#allocation2 + $0x18] sm:$0xff]  ;;  %v64_v30 = vld [vmem:[#allocation2 + $0x88] sm:$0xff] }
  0x16   :  { %148 = vmatpush.msra.mxu0 %v73_v4  ;;  %299 = vmatpush.msra.mxu1 %v73_v4  ;;  %v54_v28 = vld [vmem:[#allocation2 + $0x38] sm:$0xff]  ;;  %v59_v29 = vld [vmem:[#allocation2 + $0x60] sm:$0xff] }
  0x17   :  { %303 = vmatpush.msra.mxu2 %v72_v5  ;;  %304 = vmatpush.msra.mxu3 %v72_v5  ;;  %v468_v31 = vld [vmem:[%s496_s2] ss:$0 sm:$0xff]  ;;  %s414_s2 = smov [#allocation7]  }
  0x18   :  { %149 = vmatpush.msra.mxu0 %v72_v5  ;;  %302 = vmatpush.msra.mxu1 %v72_v5  ;;  %s252_s24 = sshll.u32 %s414_s2, 4  ;;  %s253_s24 = int_to_ptr.vmem [resolvable:$true] %s252_s24 }
  0x19   :  { %306 = vmatpush.msra.mxu2 %v71_v6  ;;  %307 = vmatpush.msra.mxu3 %v71_v6 }
  0x1a   :  { %150 = vmatpush.msra.mxu0 %v71_v6  ;;  %305 = vmatpush.msra.mxu1 %v71_v6 }
  0x1b   :  { %309 = vmatpush.msra.mxu2 %v70_v7  ;;  %310 = vmatpush.msra.mxu3 %v70_v7 }
  0x1c   :  { %151 = vmatpush.msra.mxu0 %v70_v7  ;;  %308 = vmatpush.msra.mxu1 %v70_v7 }
  0x1d   :  { %312 = vmatpush.msra.mxu2 %v69_v8  ;;  %313 = vmatpush.msra.mxu3 %v69_v8 }
  0x1e   :  { %152 = vmatpush.msra.mxu0 %v69_v8  ;;  %311 = vmatpush.msra.mxu1 %v69_v8 }
  0x1f   :  { %315 = vmatpush.msra.mxu2 %v68_v9  ;;  %316 = vmatpush.msra.mxu3 %v68_v9 }
  0x20   :  { %153 = vmatpush.msra.mxu0 %v68_v9  ;;  %314 = vmatpush.msra.mxu1 %v68_v9 }
  0x21   :  { %318 = vmatpush.msra.mxu2 %v67_v10  ;;  %319 = vmatpush.msra.mxu3 %v67_v10 }
  0x22   :  { %154 = vmatpush.msra.mxu0 %v67_v10  ;;  %317 = vmatpush.msra.mxu1 %v67_v10 }
  0x23   :  { %321 = vmatpush.msra.mxu2 %v66_v11  ;;  %322 = vmatpush.msra.mxu3 %v66_v11 }
  0x24   :  { %155 = vmatpush.msra.mxu0 %v66_v11  ;;  %320 = vmatpush.msra.mxu1 %v66_v11 }
  0x25   :  { %324 = vmatpush.msra.mxu2 %v65_v12  ;;  %325 = vmatpush.msra.mxu3 %v65_v12 }
  0x26   :  { %277 = vmatmul.msk.f32.vlgmr.msra.gmra.mxu2 %vm82_vm1, %v55_v13  ;;  %282 = vmatmul.msk.f32.vlgmr.msra.gmra.mxu3 %vm82_vm1, %v60_v14 }
  0x27   :  { %156 = vmatpush.msra.mxu0 %v65_v12  ;;  %323 = vmatpush.msra.mxu1 %v65_v12 }
  0x28   :  { %269 = vmatmul.msk.f32.vlgmr.msra.gmra.mxu0 %vm82_vm1, %v47_v15  ;;  %273 = vmatmul.msk.f32.vlgmr.msra.gmra.mxu1 %vm82_vm1, %v51_v16 }
  0x2e   :  { %278 = vmatmul.msk.f32.gmra.mxu2 %vm82_vm1, %v56_v17  ;;  %283 = vmatmul.msk.f32.gmra.mxu3 %vm82_vm1, %v61_v18 }
  0x30   :  { %270 = vmatmul.msk.f32.gmra.mxu0 %vm82_vm1, %v48_v19  ;;  %274 = vmatmul.msk.f32.gmra.mxu1 %vm82_vm1, %v52_v20 }
  0x36   :  { %279 = vmatmul.msk.f32.gmra.mxu2 %vm82_vm1, %v57_v21  ;;  %284 = vmatmul.msk.f32.gmra.mxu3 %vm82_vm1, %v62_v22 }
  0x38   :  { %271 = vmatmul.msk.f32.gmra.mxu0 %vm82_vm1, %v49_v23  ;;  %275 = vmatmul.msk.f32.gmra.mxu1 %vm82_vm1, %v53_v24 }
  0x3e   :  { %280 = vmatmul.msk.f32.gmra.mxu2 %vm82_vm1, %v58_v25  ;;  %285 = vmatmul.msk.f32.gmra.mxu3 %vm82_vm1, %v63_v26 }
  0x40   :  { %272 = vmatmul.msk.f32.gmra.mxu0 %vm82_vm1, %v50_v27  ;;  %276 = vmatmul.msk.f32.gmra.mxu1 %vm82_vm1, %v54_v28 }
  0x46   :  { %281 = vmatmul.msk.f32.gmra.mxu2 %vm82_vm1, %v59_v29  ;;  %286 = vmatmul.msk.f32.gmra.mxu3 %vm82_vm1, %v64_v30 }
  0xa5   :  { %v158_v32 = vpop.f32.mrf.mxu0  ;;  %v170_v33 = vpop.f32.mrf.mxu1 }
  0xa6   :  { %v159_v34 = vadd.f32 %v468_v31, %v158_v32  ;;  %v171_v35 = vadd.f32 %v468_v31, %v170_v33 }
  0xa8   :  { %v212_v36 = vmax.f32 %v159_v34, 0.0  ;;  %v216_v37 = vmax.f32 %v171_v35, 0.0 }
  0xa9   :  { %v182_v38 = vpop.f32.mrf.mxu2  ;;  %v197_v39 = vpop.f32.mrf.mxu3 }
  0xaa   :  { %v183_v40 = vadd.f32 %v468_v31, %v182_v38  ;;  %v198_v41 = vadd.f32 %v468_v31, %v197_v39  ;;  %230 = vst [vmem:[#allocation7] sm:$0xff] %v212_v36 }
  0xab   :  { %234 = vst [vmem:[#allocation7 + $0x20] sm:$0xff] %v216_v37 }
  0xac   :  { %v220_v42 = vmax.f32 %v183_v40, 0.0  ;;  %v225_v43 = vmax.f32 %v198_v41, 0.0 }
  0xad   :  { %v161_v44 = vpop.f32.mrf.mxu0  ;;  %v173_v45 = vpop.f32.mrf.mxu1 }
  0xae   :  { %238 = vst [vmem:[#allocation7 + $0x40] sm:$0xff] %v220_v42  ;;  %v162_v46 = vadd.f32 %v468_v31, %v161_v44  ;;  %v174_v47 = vadd.f32 %v468_v31, %v173_v45 }
  0xaf   :  { %243 = vst [vmem:[#allocation7 + $0x68] sm:$0xff] %v225_v43 }
  0xb0   :  { %v213_v48 = vmax.f32 %v162_v46, 0.0  ;;  %v217_v49 = vmax.f32 %v174_v47, 0.0 }
  0xb1   :  { %v185_v50 = vpop.f32.mrf.mxu2  ;;  %v200_v51 = vpop.f32.mrf.mxu3 }
  0xb2   :  { %v186_v52 = vadd.f32 %v468_v31, %v185_v50  ;;  %v201_v53 = vadd.f32 %v468_v31, %v200_v51  ;;  %231 = vst [vmem:[#allocation7 + $0x8] sm:$0xff] %v213_v48 }
  0xb3   :  { %235 = vst [vmem:[#allocation7 + $0x28] sm:$0xff] %v217_v49 }
  0xb4   :  { %v221_v54 = vmax.f32 %v186_v52, 0.0  ;;  %v226_v55 = vmax.f32 %v201_v53, 0.0 }
  0xb5   :  { %v164_v56 = vpop.f32.mrf.mxu0  ;;  %v176_v57 = vpop.f32.mrf.mxu1 }
  0xb6   :  { %239 = vst [vmem:[#allocation7 + $0x48] sm:$0xff] %v221_v54  ;;  %v165_v58 = vadd.f32 %v468_v31, %v164_v56  ;;  %v177_v59 = vadd.f32 %v468_v31, %v176_v57 }
  0xb7   :  { %244 = vst [vmem:[#allocation7 + $0x70] sm:$0xff] %v226_v55 }
  0xb8   :  { %v214_v60 = vmax.f32 %v165_v58, 0.0  ;;  %v218_v61 = vmax.f32 %v177_v59, 0.0 }
  0xb9   :  { %v188_v62 = vpop.f32.mrf.mxu2  ;;  %v203_v63 = vpop.f32.mrf.mxu3 }
  0xba   :  { %v189_v0 = vadd.f32 %v468_v31, %v188_v62  ;;  %v204_v1 = vadd.f32 %v468_v31, %v203_v63  ;;  %232 = vst [vmem:[#allocation7 + $0x10] sm:$0xff] %v214_v60 }
  0xbb   :  { %236 = vst [vmem:[#allocation7 + $0x30] sm:$0xff] %v218_v61 }
  0xbc   :  { %v222_v2 = vmax.f32 %v189_v0, 0.0  ;;  %v227_v3 = vmax.f32 %v204_v1, 0.0 }
  0xbd   :  { %v167_v4 = vpop.f32.mrf.mxu0  ;;  %v179_v5 = vpop.f32.mrf.mxu1 }
  0xbe   :  { %240 = vst [vmem:[#allocation7 + $0x50] sm:$0xff] %v222_v2  ;;  %v168_v6 = vadd.f32 %v468_v31, %v167_v4  ;;  %v180_v7 = vadd.f32 %v468_v31, %v179_v5 }
  0xbf   :  { %245 = vst [vmem:[#allocation7 + $0x78] sm:$0xff] %v227_v3 }
  0xc0   :  { %v215_v8 = vmax.f32 %v168_v6, 0.0  ;;  %v219_v9 = vmax.f32 %v180_v7, 0.0 }
  0xc1   :  { %v191_v10 = vpop.f32.mrf.mxu2  ;;  %v206_v11 = vpop.f32.mrf.mxu3 }
  0xc2   :  { %v192_v12 = vadd.f32 %v468_v31, %v191_v10  ;;  %v207_v13 = vadd.f32 %v468_v31, %v206_v11  ;;  %233 = vst [vmem:[#allocation7 + $0x18] sm:$0xff] %v215_v8 }
  0xc3   :  { %237 = vst [vmem:[#allocation7 + $0x38] sm:$0xff] %v219_v9 }
  0xc4   :  { %v223_v14 = vmax.f32 %v192_v12, 0.0  ;;  %v228_v15 = vmax.f32 %v207_v13, 0.0 }
  0xc6   :  { %241 = vst [vmem:[#allocation7 + $0x58] sm:$0xff] %v223_v14 }
  0xc7   :  { %246 = vst [vmem:[#allocation7 + $0x80] sm:$0xff] %v228_v15 }
  0xc9   :  { %v194_v16 = vpop.f32.mrf.mxu2  ;;  %v209_v17 = vpop.f32.mrf.mxu3 }
  0xca   :  { %v195_v18 = vadd.f32 %v468_v31, %v194_v16  ;;  %v210_v19 = vadd.f32 %v468_v31, %v209_v17 }
  0xcc   :  { %v224_v20 = vmax.f32 %v195_v18, 0.0  ;;  %v229_v21 = vmax.f32 %v210_v19, 0.0 }
  0xce   :  { %242 = vst [vmem:[#allocation7 + $0x60] sm:$0xff] %v224_v20 }
  0xcf   :  { %247 = vst [vmem:[#allocation7 + $0x88] sm:$0xff] %v229_v21 }
  0xd0   :  { %260 = dma.vmem_to_hbm [thread:$0]  %s253_s24, 2304, %s255_s27, [#allocation4], %s411_s20, %s411_s20, %s412_s21  }
  0xd1   :  { %408 = dma.done.wait [#allocation4], 2304  }
  0xd2   :  { %409 = vsyncadd [#allocation4], 4294964992 }
  0xd3   :  { %265 = vsyncpa [#allocation3], 1 }
  0xd4   :  { %266 = vsyncpa [#allocation6], 1 }
  0xd5   :  { %267 = vsyncpa [#allocation4], 1 }

</bundles_post_ra>
